<compile_context>
chip_gen: v6e
topology: v6e:2x2x1
jax: 0.10.0
libtpu: 0.0.40
codegen_flags: <defaults>
</compile_context>

<pallas_src>
import jax
import jax.numpy as jnp
from jax.experimental import pallas as pl
from jax.experimental.pallas import tpu as pltpu

LANE = 128
_VMEM_LIMIT = 32 * 1024 * 1024  # safe on v5e/v6e (128 MiB) and v7x (64 MiB)


def _round_up(x, m):
    return (x + m - 1) // m * m


def _pad2d(a, rows, cols, dtype):
    """Cast to `dtype` and zero-pad to (rows, cols); no-op pad when aligned."""
    a = a.astype(dtype)
    pr, pc = rows - a.shape[0], cols - a.shape[1]
    if pr or pc:
        a = jnp.pad(a, ((0, pr), (0, pc)))
    return a


# ---------------------------------------------------------------------------
# Kernel bodies
# ---------------------------------------------------------------------------

def _support_kernel(x_ref, w_ref, o_ref):
    """support = x @ W for one row tile: (TM, F_in) @ (F_in, F_pad)."""
    o_ref[...] = jnp.dot(
        x_ref[...], w_ref[...], preferred_element_type=jnp.float32
    ).astype(o_ref.dtype)


def _adj_layer1_kernel(adj_ref, s1_ref, w2_ref, o_ref, acc_ref):
    """o = relu(adj @ support1) @ W2, accumulated over the reduction axis k."""
    k = pl.program_id(1)

    @pl.when(k == 0)
    def _():
        acc_ref[...] = jnp.zeros_like(acc_ref)

    acc_ref[...] += jnp.dot(
        adj_ref[...], s1_ref[...], preferred_element_type=jnp.float32
    )

    @pl.when(k == pl.num_programs(1) - 1)
    def _():
        h = jnp.maximum(acc_ref[...], 0.0).astype(w2_ref.dtype)  # fused ReLU
        o_ref[...] = jnp.dot(
            h, w2_ref[...], preferred_element_type=jnp.float32
        ).astype(o_ref.dtype)


def _adj_layer2_kernel(adj_ref, s2_ref, o_ref):
    """o = adj @ support2; the f32 output block doubles as the accumulator."""
    @pl.when(pl.program_id(1) == 0)
    def _():
        o_ref[...] = jnp.zeros_like(o_ref)

    o_ref[...] += jnp.dot(
        adj_ref[...], s2_ref[...], preferred_element_type=jnp.float32
    )


# ---------------------------------------------------------------------------
# pallas_call wrappers
# ---------------------------------------------------------------------------

def _support_matmul(x, w, tm):
    """Row-tiled x @ w -> bf16 with a lane-dense (multiple-of-128) feature dim."""
    n_pad, f_in = x.shape
    f_pad = w.shape[1]
    return pl.pallas_call(
        _support_kernel,
        out_shape=jax.ShapeDtypeStruct((n_pad, f_pad), jnp.bfloat16),
        grid_spec=pltpu.PrefetchScalarGridSpec(
            num_scalar_prefetch=0,
            grid=(n_pad // tm,),
            in_specs=[
                pl.BlockSpec((tm, f_in), lambda i: (i, 0)),
                pl.BlockSpec((f_in, f_pad), lambda i: (0, 0)),
            ],
            out_specs=pl.BlockSpec((tm, f_pad), lambda i: (i, 0)),
        ),
        compiler_params=pltpu.CompilerParams(
            dimension_semantics=("parallel",),
            vmem_limit_bytes=_VMEM_LIMIT,
        ),
        cost_estimate=pl.CostEstimate(
            flops=2 * n_pad * f_in * f_pad,
            transcendentals=0,
            bytes_accessed=x.size * x.dtype.itemsize
            + w.size * w.dtype.itemsize
            + n_pad * f_pad * 2,
        ),
    )(x, w)


def _adj_pass_layer1(adj, s1, w2, tm, tk):
    """support2 = relu(adj @ support1) @ W2, tiled over (row, reduction)."""
    n_pad = adj.shape[0]
    h_pad = s1.shape[1]
    o_pad = w2.shape[1]
    return pl.pallas_call(
        _adj_layer1_kernel,
        out_shape=jax.ShapeDtypeStruct((n_pad, o_pad), jnp.bfloat16),
        grid_spec=pltpu.PrefetchScalarGridSpec(
            num_scalar_prefetch=0,
            grid=(n_pad // tm, n_pad // tk),
            in_specs=[
                pl.BlockSpec((tm, tk), lambda i, k: (i, k)),
                pl.BlockSpec((tk, h_pad), lambda i, k: (k, 0)),
                pl.BlockSpec((h_pad, o_pad), lambda i, k: (0, 0)),
            ],
            out_specs=pl.BlockSpec((tm, o_pad), lambda i, k: (i, 0)),
            scratch_shapes=[pltpu.VMEM((tm, h_pad), jnp.float32)],
        ),
        compiler_params=pltpu.CompilerParams(
            dimension_semantics=("parallel", "arbitrary"),
            vmem_limit_bytes=_VMEM_LIMIT,
        ),
        cost_estimate=pl.CostEstimate(
            flops=2 * n_pad * n_pad * h_pad + 2 * n_pad * h_pad * o_pad,
            transcendentals=0,
            bytes_accessed=adj.size * adj.dtype.itemsize
            + s1.size * s1.dtype.itemsize
            + w2.size * w2.dtype.itemsize
            + n_pad * o_pad * 2,
        ),
    )(adj, s1, w2)


def _adj_pass_layer2(adj, s2, tm, tk):
    """out = adj @ support2, tiled over (row, reduction); f32 output."""
    n_pad = adj.shape[0]
    o_pad = s2.shape[1]
    return pl.pallas_call(
        _adj_layer2_kernel,
        out_shape=jax.ShapeDtypeStruct((n_pad, o_pad), jnp.float32),
        grid_spec=pltpu.PrefetchScalarGridSpec(
            num_scalar_prefetch=0,
            grid=(n_pad // tm, n_pad // tk),
            in_specs=[
                pl.BlockSpec((tm, tk), lambda i, k: (i, k)),
                pl.BlockSpec((tk, o_pad), lambda i, k: (k, 0)),
            ],
            out_specs=pl.BlockSpec((tm, o_pad), lambda i, k: (i, 0)),
        ),
        compiler_params=pltpu.CompilerParams(
            dimension_semantics=("parallel", "arbitrary"),
            vmem_limit_bytes=_VMEM_LIMIT,
        ),
        cost_estimate=pl.CostEstimate(
            flops=2 * n_pad * n_pad * o_pad,
            transcendentals=0,
            bytes_accessed=adj.size * adj.dtype.itemsize
            + s2.size * s2.dtype.itemsize
            + n_pad * o_pad * 4,
        ),
    )(adj, s2)


# ---------------------------------------------------------------------------
# Full forward
# ---------------------------------------------------------------------------

def gcn_forward(x, adj, w1, w2, *, tile=512):
    """GCN forward (eval): adj @ relu(adj @ (x @ W1)) @ W2."""
    n, f_in = x.shape
    hid = w1.shape[1]
    out_features = w2.shape[1]

    # Pick adj tile sizes: stream (tile, tile) bf16 blocks for large graphs
    # (~0.5 MiB/buffer with the default tile, comfortably double-buffered even
    # under the 64 MiB v7x VMEM); for small graphs use one 128-aligned block.
    tile = _round_up(tile, LANE)
    if n <= tile:
        n_pad = _round_up(n, LANE)
        tm = tk = n_pad
    else:
        n_pad = _round_up(n, tile)
        tm = tk = tile

    h_pad = _round_up(hid, LANE)           # lane-dense hidden dim
    o_pad = _round_up(out_features, LANE)  # lane-dense output dim

    # bf16 MXU inputs (f32 accumulation inside kernels); zero padding keeps
    # the math exact for the un-padded region.
    bf16 = jnp.bfloat16
    x_p = _pad2d(x, n_pad, f_in, bf16)
    adj_p = _pad2d(adj, n_pad, n_pad, bf16)
    w1_p = _pad2d(w1, f_in, h_pad, bf16)
    w2_p = _pad2d(w2, h_pad, o_pad, bf16)

    # Layer-1 support (hoisted out of the adj reduction loop).
    s1 = _support_matmul(x_p, w1_p, tm)             # (N_pad, H_pad) bf16
    # Layer-1 adj pass, fused with ReLU and h @ W2 (h never hits HBM in f32).
    s2 = _adj_pass_layer1(adj_p, s1, w2_p, tm, tk)  # (N_pad, O_pad) bf16
    # Layer-2 adj pass (accumulates directly into the f32 output block).
    out_p = _adj_pass_layer2(adj_p, s2, tm, tk)     # (N_pad, O_pad) f32
    return out_p[:n, :out_features]


def glorot_uniform(key, shape, dtype=jnp.float32):
    fan_in, fan_out = shape
    limit = jnp.sqrt(6.0 / (fan_in + fan_out)).astype(dtype)
    return jax.random.uniform(key, shape, dtype, -limit, limit)


if __name__ == "__main__":
    key = jax.random.PRNGKey(0)
    k_x, k_adj, k_w1, k_w2 = jax.random.split(key, 4)

    # Small synthetic graph: N nodes, in_features, hids=[16], out_features.
    N = 64
    in_features = 32
    hid = 16
    out_features = 8

    # Node features.
    x = jax.random.normal(k_x, (N, in_features), dtype=jnp.float32)

    # Dense symmetric-normalized adjacency with self-loops: D^-1/2 (A+I) D^-1/2.
    a = (jax.random.uniform(k_adj, (N, N)) < 0.1).astype(jnp.float32)
    a = jnp.maximum(a, a.T) + jnp.eye(N, dtype=jnp.float32)
    deg = jnp.sum(a, axis=1)
    d_inv_sqrt = 1.0 / jnp.sqrt(deg)
    adj = a * d_inv_sqrt[:, None] * d_inv_sqrt[None, :]

    # Deterministic parameter init (GCNConv weights, bias=False).
    w1 = glorot_uniform(k_w1, (in_features, hid))
    w2 = glorot_uniform(k_w2, (hid, out_features))

    fwd = jax.jit(gcn_forward)
    out = fwd(x, adj, w1, w2)
    jax.block_until_ready(out)

    # Sanity-check against plain-JAX f32 reference (bf16 MXU inputs with f32
    # accumulation -> relaxed tolerance).
    ref = adj @ jnp.maximum(adj @ (x @ w1), 0.0) @ w2
    assert out.shape == (N, out_features)
    assert jnp.allclose(out, ref, atol=5e-2, rtol=5e-2), float(
        jnp.max(jnp.abs(out - ref)))

    print("KERNEL_OK")
</pallas_src>

<mosaic_0001>
module attributes {stable_mosaic.version = 11 : i64} {
  func.func @_adj_layer2_kernel(%arg0: i32, %arg1: i32, %arg2: memref<128x128xbf16, #tpu.memory_space<vmem>>, %arg3: memref<128x128xbf16, #tpu.memory_space<vmem>>, %arg4: memref<128x128xf32, #tpu.memory_space<vmem>>) attributes {dimension_semantics = [#tpu.dimension_semantics<parallel>, #tpu.dimension_semantics<arbitrary>], iteration_bounds = array<i64: 1, 1>, scalar_prefetch = 0 : i64, scratch_operands = 0 : i64, tpu.core_type = #tpu.core_type<tc>, window_params = [{transform_indices = @transform_0, window_bounds = array<i64: 128, 128>}, {transform_indices = @transform_1, window_bounds = array<i64: 128, 128>}, {transform_indices = @transform_2, window_bounds = array<i64: 128, 128>}]} {
    %c0_i32 = arith.constant 0 : i32
    %0 = arith.cmpi eq, %arg1, %c0_i32 : i32
    %1 = arith.extui %0 : i1 to i32
    %c0_i32_0 = arith.constant 0 : i32
    %2 = arith.cmpi ne, %1, %c0_i32_0 : i32
    scf.if %2 {
      %cst_8 = arith.constant 0.000000e+00 : f32
      %9 = vector.broadcast %cst_8 : f32 to vector<128x128xf32>
      %c0_9 = arith.constant 0 : index
      %c0_10 = arith.constant 0 : index
      %10 = vector.load %arg4[%c0_9, %c0_10] : memref<128x128xf32, #tpu.memory_space<vmem>>, vector<128x128xf32>
      tpu.vector_store %arg4[%c0_9, %c0_10], %9 {strides = array<i32>} : memref<128x128xf32, #tpu.memory_space<vmem>>, vector<128x128xf32>,
    } else {
    }
    %c0 = arith.constant 0 : index
    %c0_1 = arith.constant 0 : index
    %3 = vector.load %arg4[%c0, %c0_1] : memref<128x128xf32, #tpu.memory_space<vmem>>, vector<128x128xf32>
    %c0_2 = arith.constant 0 : index
    %c0_3 = arith.constant 0 : index
    %4 = vector.load %arg2[%c0_2, %c0_3] : memref<128x128xbf16, #tpu.memory_space<vmem>>, vector<128x128xbf16>
    %c0_4 = arith.constant 0 : index
    %c0_5 = arith.constant 0 : index
    %5 = vector.load %arg3[%c0_4, %c0_5] : memref<128x128xbf16, #tpu.memory_space<vmem>>, vector<128x128xbf16>
    %cst = arith.constant dense<0.000000e+00> : vector<128x128xf32>
    %6 = tpu.matmul %4, %5, %cst {dimension_numbers = #tpu.dot_dimension_numbers<[1], [0], [0], [1], [0, 0, 1, 1], [], []>} : vector<128x128xbf16>, vector<128x128xbf16>, vector<128x128xf32> -> vector<128x128xf32>
    %7 = arith.addf %3, %6 : vector<128x128xf32>
    %c0_6 = arith.constant 0 : index
    %c0_7 = arith.constant 0 : index
    %8 = vector.load %arg4[%c0_6, %c0_7] : memref<128x128xf32, #tpu.memory_space<vmem>>, vector<128x128xf32>
    tpu.vector_store %arg4[%c0_6, %c0_7], %7 {strides = array<i32>} : memref<128x128xf32, #tpu.memory_space<vmem>>, vector<128x128xf32>,
    return
  }
  func.func @transform_0(%arg0: i32, %arg1: i32) -> (i32, i32) {
    %c0_i32 = arith.constant 0 : i32
    return %arg0, %arg1 : i32, i32
  }
  func.func @transform_1(%arg0: i32, %arg1: i32) -> (i32, i32) {
    %c0_i32 = arith.constant 0 : i32
    %c0_i32_0 = arith.constant 0 : i32
    return %arg1, %c0_i32 : i32, i32
  }
  func.func @transform_2(%arg0: i32, %arg1: i32) -> (i32, i32) {
    %c0_i32 = arith.constant 0 : i32
    %c0_i32_0 = arith.constant 0 : i32
    return %arg0, %c0_i32 : i32, i32
  }
}

module attributes {stable_mosaic.version = 11 : i64} {
  func.func @_support_kernel(%arg0: i32, %arg1: memref<128x32xbf16, #tpu.memory_space<vmem>>, %arg2: memref<32x128xbf16, #tpu.memory_space<vmem>>, %arg3: memref<128x128xbf16, #tpu.memory_space<vmem>>) attributes {dimension_semantics = [#tpu.dimension_semantics<parallel>], iteration_bounds = array<i64: 1>, scalar_prefetch = 0 : i64, scratch_operands = 0 : i64, tpu.core_type = #tpu.core_type<tc>, window_params = [{transform_indices = @transform_0, window_bounds = array<i64: 128, 32>}, {pipeline_mode = #tpu.pipeline_mode<synchronous>, transform_indices = @transform_1, window_bounds = array<i64: 32, 128>}, {transform_indices = @transform_2, window_bounds = array<i64: 128, 128>}]} {
    %c0 = arith.constant 0 : index
    %c0_0 = arith.constant 0 : index
    %0 = vector.load %arg1[%c0, %c0_0] : memref<128x32xbf16, #tpu.memory_space<vmem>>, vector<128x32xbf16>
    %c0_1 = arith.constant 0 : index
    %c0_2 = arith.constant 0 : index
    %1 = vector.load %arg2[%c0_1, %c0_2] : memref<32x128xbf16, #tpu.memory_space<vmem>>, vector<32x128xbf16>
    %cst = arith.constant dense<0.000000e+00> : vector<128x128xf32>
    %2 = tpu.matmul %0, %1, %cst {dimension_numbers = #tpu.dot_dimension_numbers<[1], [0], [0], [1], [0, 0, 1, 1], [], []>} : vector<128x32xbf16>, vector<32x128xbf16>, vector<128x128xf32> -> vector<128x128xf32>
    %3 = arith.truncf %2 : vector<128x128xf32> to vector<128x128xbf16>
    %c0_3 = arith.constant 0 : index
    %c0_4 = arith.constant 0 : index
    %4 = vector.load %arg3[%c0_3, %c0_4] : memref<128x128xbf16, #tpu.memory_space<vmem>>, vector<128x128xbf16>
    tpu.vector_store %arg3[%c0_3, %c0_4], %3 {strides = array<i32>} : memref<128x128xbf16, #tpu.memory_space<vmem>>, vector<128x128xbf16>,
    return
  }
  func.func @transform_0(%arg0: i32) -> (i32, i32) {
    %c0_i32 = arith.constant 0 : i32
    %c0_i32_0 = arith.constant 0 : i32
    return %arg0, %c0_i32 : i32, i32
  }
  func.func @transform_1(%arg0: i32) -> (i32, i32) {
    %c0_i32 = arith.constant 0 : i32
    %c0_i32_0 = arith.constant 0 : i32
    %c0_i32_1 = arith.constant 0 : i32
    return %c0_i32, %c0_i32_0 : i32, i32
  }
  func.func @transform_2(%arg0: i32) -> (i32, i32) {
    %c0_i32 = arith.constant 0 : i32
    %c0_i32_0 = arith.constant 0 : i32
    return %arg0, %c0_i32 : i32, i32
  }
}

module attributes {stable_mosaic.version = 11 : i64} {
  func.func @_adj_layer1_kernel(%arg0: i32, %arg1: i32, %arg2: memref<128x128xbf16, #tpu.memory_space<vmem>>, %arg3: memref<128x128xbf16, #tpu.memory_space<vmem>>, %arg4: memref<128x128xbf16, #tpu.memory_space<vmem>>, %arg5: memref<128x128xbf16, #tpu.memory_space<vmem>>, %arg6: memref<128x128xf32, #tpu.memory_space<vmem>>) attributes {dimension_semantics = [#tpu.dimension_semantics<parallel>, #tpu.dimension_semantics<arbitrary>], iteration_bounds = array<i64: 1, 1>, scalar_prefetch = 0 : i64, scratch_operands = 1 : i64, tpu.core_type = #tpu.core_type<tc>, window_params = [{transform_indices = @transform_0, window_bounds = array<i64: 128, 128>}, {transform_indices = @transform_1, window_bounds = array<i64: 128, 128>}, {pipeline_mode = #tpu.pipeline_mode<synchronous>, transform_indices = @transform_2, window_bounds = array<i64: 128, 128>}, {transform_indices = @transform_3, window_bounds = array<i64: 128, 128>}]} {
    %c0_i32 = arith.constant 0 : i32
    %0 = arith.cmpi eq, %arg1, %c0_i32 : i32
    %1 = arith.extui %0 : i1 to i32
    %c0_i32_0 = arith.constant 0 : i32
    %2 = arith.cmpi ne, %1, %c0_i32_0 : i32
    scf.if %2 {
      %cst_10 = arith.constant 0.000000e+00 : f32
      %12 = vector.broadcast %cst_10 : f32 to vector<128x128xf32>
      %c0_11 = arith.constant 0 : index
      %c0_12 = arith.constant 0 : index
      %13 = vector.load %arg6[%c0_11, %c0_12] : memref<128x128xf32, #tpu.memory_space<vmem>>, vector<128x128xf32>
      tpu.vector_store %arg6[%c0_11, %c0_12], %12 {strides = array<i32>} : memref<128x128xf32, #tpu.memory_space<vmem>>, vector<128x128xf32>,
    } else {
    }
    %c0 = arith.constant 0 : index
    %c0_1 = arith.constant 0 : index
    %3 = vector.load %arg6[%c0, %c0_1] : memref<128x128xf32, #tpu.memory_space<vmem>>, vector<128x128xf32>
    %c0_2 = arith.constant 0 : index
    %c0_3 = arith.constant 0 : index
    %4 = vector.load %arg2[%c0_2, %c0_3] : memref<128x128xbf16, #tpu.memory_space<vmem>>, vector<128x128xbf16>
    %c0_4 = arith.constant 0 : index
    %c0_5 = arith.constant 0 : index
    %5 = vector.load %arg3[%c0_4, %c0_5] : memref<128x128xbf16, #tpu.memory_space<vmem>>, vector<128x128xbf16>
    %cst = arith.constant dense<0.000000e+00> : vector<128x128xf32>
    %6 = tpu.matmul %4, %5, %cst {dimension_numbers = #tpu.dot_dimension_numbers<[1], [0], [0], [1], [0, 0, 1, 1], [], []>} : vector<128x128xbf16>, vector<128x128xbf16>, vector<128x128xf32> -> vector<128x128xf32>
    %7 = arith.addf %3, %6 : vector<128x128xf32>
    %c0_6 = arith.constant 0 : index
    %c0_7 = arith.constant 0 : index
    %8 = vector.load %arg6[%c0_6, %c0_7] : memref<128x128xf32, #tpu.memory_space<vmem>>, vector<128x128xf32>
    tpu.vector_store %arg6[%c0_6, %c0_7], %7 {strides = array<i32>} : memref<128x128xf32, #tpu.memory_space<vmem>>, vector<128x128xf32>,
    %c0_i32_8 = arith.constant 0 : i32
    %9 = arith.cmpi eq, %arg1, %c0_i32_8 : i32
    %10 = arith.extui %9 : i1 to i32
    %c0_i32_9 = arith.constant 0 : i32
    %11 = arith.cmpi ne, %10, %c0_i32_9 : i32
    scf.if %11 {
      %c0_10 = arith.constant 0 : index
      %c0_11 = arith.constant 0 : index
      %12 = vector.load %arg6[%c0_10, %c0_11] : memref<128x128xf32, #tpu.memory_space<vmem>>, vector<128x128xf32>
      %cst_12 = arith.constant 0.000000e+00 : f32
      %13 = vector.broadcast %cst_12 : f32 to vector<128x128xf32>
      %14 = arith.maximumf %12, %13 : vector<128x128xf32>
      %15 = arith.truncf %14 : vector<128x128xf32> to vector<128x128xbf16>
      %c0_13 = arith.constant 0 : index
      %c0_14 = arith.constant 0 : index
      %16 = vector.load %arg4[%c0_13, %c0_14] : memref<128x128xbf16, #tpu.memory_space<vmem>>, vector<128x128xbf16>
      %cst_15 = arith.constant dense<0.000000e+00> : vector<128x128xf32>
      %17 = tpu.matmul %15, %16, %cst_15 {dimension_numbers = #tpu.dot_dimension_numbers<[1], [0], [0], [1], [0, 0, 1, 1], [], []>} : vector<128x128xbf16>, vector<128x128xbf16>, vector<128x128xf32> -> vector<128x128xf32>
      %18 = arith.truncf %17 : vector<128x128xf32> to vector<128x128xbf16>
      %c0_16 = arith.constant 0 : index
      %c0_17 = arith.constant 0 : index
      %19 = vector.load %arg5[%c0_16, %c0_17] : memref<128x128xbf16, #tpu.memory_space<vmem>>, vector<128x128xbf16>
      tpu.vector_store %arg5[%c0_16, %c0_17], %18 {strides = array<i32>} : memref<128x128xbf16, #tpu.memory_space<vmem>>, vector<128x128xbf16>,
    } else {
    }
    return
  }
  func.func @transform_0(%arg0: i32, %arg1: i32) -> (i32, i32) {
    %c0_i32 = arith.constant 0 : i32
    return %arg0, %arg1 : i32, i32
  }
  func.func @transform_1(%arg0: i32, %arg1: i32) -> (i32, i32) {
    %c0_i32 = arith.constant 0 : i32
    %c0_i32_0 = arith.constant 0 : i32
    return %arg1, %c0_i32 : i32, i32
  }
  func.func @transform_2(%arg0: i32, %arg1: i32) -> (i32, i32) {
    %c0_i32 = arith.constant 0 : i32
    %c0_i32_0 = arith.constant 0 : i32
    %c0_i32_1 = arith.constant 0 : i32
    return %c0_i32, %c0_i32_0 : i32, i32
  }
  func.func @transform_3(%arg0: i32, %arg1: i32) -> (i32, i32) {
    %c0_i32 = arith.constant 0 : i32
    %c0_i32_0 = arith.constant 0 : i32
    return %arg0, %c0_i32 : i32, i32
  }
}

</mosaic_0001>

<bundles_post_ra>
// kernel: gcn_forward.5
= control target key start
LH: loop header
LB: loop body
LE: loop exit
PB: predicated region body
PF: predicated region fallthrough
CT: control target
= control target key end

     0   :  { %s517_s1 = inlined_call_operand.vmem [shape: bf16[128,128], index: 1, kind: input, shape index: {}]   ;;  %s518_s0 = inlined_call_operand.vmem [shape: bf16[128,128], index: 0, kind: input, shape index: {}]   ;;  %s519_s2 = inlined_call_operand.vmem [shape: f32[128,128], index: 2, kind: output, shape index: {}]  }
   0x1   :  { %v390_v0 = vld [vmem:[%s517_s1 + $0x38] sm:$0xff]   ;;  %v391_v1 = vld [vmem:[%s517_s1 + $0x30] sm:$0xff]   ;;  %v392_v2 = vld [vmem:[%s517_s1 + $0x28] sm:$0xff]  }
   0x2   :  { %341 = vmatprep.subr.bf16.mxu0 %v390_v0  ;;  %373 = vmatprep.subr.bf16.mxu1 %v390_v0  ;;  %v393_v3 = vld [vmem:[%s517_s1 + $0x20] sm:$0xff]   ;;  %v394_v6 = vld [vmem:[%s517_s1 + $0x18] sm:$0xff]   ;;  %v395_v7 = vld [vmem:[%s517_s1 + $0x10] sm:$0xff]  }
   0x3   :  { %342 = vmatpush3.bf16.msra.mxu0 %v390_v0  ;;  %381 = vmatpush3.bf16.msra.mxu1 %v390_v0  ;;  %v398_v4 = vld [vmem:[%s518_s0] sm:$0xff]   ;;  %v396_v8 = vld [vmem:[%s517_s1 + $0x8] sm:$0xff]   ;;  %v402_v12 = vld [vmem:[%s518_s0 + $0x10] sm:$0xff]  }
   0x4   :  { %343 = vmatprep.subr.bf16.mxu0 %v391_v1  ;;  %374 = vmatprep.subr.bf16.mxu1 %v391_v1  ;;  %v399_v5 = vld [vmem:[%s518_s0 + $0x20] sm:$0xff]   ;;  %v400_v10 = vld [vmem:[%s518_s0 + $0x8] sm:$0xff]   ;;  %v403_v13 = vld [vmem:[%s518_s0 + $0x30] sm:$0xff]  }
   0x5   :  { %357 = vmatprep.mubr.bf16.mxu0 %v398_v4  ;;  %365 = vmatprep.mubr.bf16.mxu1 %v399_v5  ;;  %v397_v9 = vld [vmem:[%s517_s1] sm:$0xff]   ;;  %v401_v11 = vld [vmem:[%s518_s0 + $0x28] sm:$0xff]   ;;  %v404_v14 = vld [vmem:[%s518_s0 + $0x18] sm:$0xff]  }
   0x6   :  { %v405_v15 = vld [vmem:[%s518_s0 + $0x38] sm:$0xff]  }
   0x7   :  { %344 = vmatpush3.bf16.msra.mxu0 %v391_v1  ;;  %382 = vmatpush3.bf16.msra.mxu1 %v391_v1 }
   0x8   :  { %345 = vmatprep.subr.bf16.mxu0 %v392_v2  ;;  %375 = vmatprep.subr.bf16.mxu1 %v392_v2 }
   0xb   :  { %346 = vmatpush3.bf16.msra.mxu0 %v392_v2  ;;  %383 = vmatpush3.bf16.msra.mxu1 %v392_v2 }
   0xc   :  { %347 = vmatprep.subr.bf16.mxu0 %v393_v3  ;;  %376 = vmatprep.subr.bf16.mxu1 %v393_v3 }
   0xf   :  { %348 = vmatpush3.bf16.msra.mxu0 %v393_v3  ;;  %384 = vmatpush3.bf16.msra.mxu1 %v393_v3 }
  0x10   :  { %349 = vmatprep.subr.bf16.mxu0 %v394_v6  ;;  %377 = vmatprep.subr.bf16.mxu1 %v394_v6 }
  0x13   :  { %350 = vmatpush3.bf16.msra.mxu0 %v394_v6  ;;  %385 = vmatpush3.bf16.msra.mxu1 %v394_v6 }
  0x14   :  { %351 = vmatprep.subr.bf16.mxu0 %v395_v7  ;;  %378 = vmatprep.subr.bf16.mxu1 %v395_v7 }
  0x17   :  { %352 = vmatpush3.bf16.msra.mxu0 %v395_v7  ;;  %386 = vmatpush3.bf16.msra.mxu1 %v395_v7 }
  0x18   :  { %353 = vmatprep.subr.bf16.mxu0 %v396_v8  ;;  %379 = vmatprep.subr.bf16.mxu1 %v396_v8 }
  0x1b   :  { %354 = vmatpush3.bf16.msra.mxu0 %v396_v8  ;;  %387 = vmatpush3.bf16.msra.mxu1 %v396_v8 }
  0x1c   :  { %355 = vmatprep.subr.bf16.mxu0 %v397_v9  ;;  %380 = vmatprep.subr.bf16.mxu1 %v397_v9 }
  0x1f   :  { %356 = vmatpush3.bf16.msra.mxu0 %v397_v9  ;;  %388 = vmatpush3.bf16.msra.mxu1 %v397_v9 }
  0x22   :  { %358 = vmatmul.mubr.bf16.vlgmr.msra.gmra.mxu0 %v400_v10  ;;  %366 = vmatmul.mubr.bf16.vlgmr.msra.gmra.mxu1 %v401_v11 }
  0x23   :  { %361 = vmatprep.mubr.bf16.mxu0 %v402_v12  ;;  %369 = vmatprep.mubr.bf16.mxu1 %v403_v13 }
  0x2a   :  { %362 = vmatmul.mubr.bf16.gmra.mxu0 %v404_v14  ;;  %370 = vmatmul.mubr.bf16.gmra.mxu1 %v405_v15 }
  0xe2   :  { %v359_v16 = vpop.f32.mrf.mxu0  ;;  %v367_v17 = vpop.f32.mrf.mxu1 }
  0xe3   :  { %291 = vst [vmem:[%s519_s2 + $0x10] sm:$0xff] %v359_v16  ;;  %299 = vst [vmem:[%s519_s2 + $0x50] sm:$0xff] %v367_v17 }
  0xe4   :  { %v210_v18 = vpop.f32.mrf.mxu0  ;;  %v242_v19 = vpop.f32.mrf.mxu1 }
  0xe5   :  { %289 = vst [vmem:[%s519_s2] sm:$0xff] %v210_v18  ;;  %297 = vst [vmem:[%s519_s2 + $0x40] sm:$0xff] %v242_v19 }
  0xe6   :  { %v360_v20 = vpop.f32.mrf.mxu0  ;;  %v368_v21 = vpop.f32.mrf.mxu1 }
  0xe7   :  { %292 = vst [vmem:[%s519_s2 + $0x18] sm:$0xff] %v360_v20  ;;  %300 = vst [vmem:[%s519_s2 + $0x58] sm:$0xff] %v368_v21 }
  0xe8   :  { %v213_v22 = vpop.f32.mrf.mxu0  ;;  %v245_v23 = vpop.f32.mrf.mxu1 }
  0xe9   :  { %290 = vst [vmem:[%s519_s2 + $0x8] sm:$0xff] %v213_v22  ;;  %298 = vst [vmem:[%s519_s2 + $0x48] sm:$0xff] %v245_v23 }
  0xea   :  { %v363_v24 = vpop.f32.mrf.mxu0  ;;  %v371_v25 = vpop.f32.mrf.mxu1 }
  0xeb   :  { %295 = vst [vmem:[%s519_s2 + $0x30] sm:$0xff] %v363_v24  ;;  %303 = vst [vmem:[%s519_s2 + $0x70] sm:$0xff] %v371_v25 }
  0xec   :  { %v226_v26 = vpop.f32.mrf.mxu0  ;;  %v258_v27 = vpop.f32.mrf.mxu1 }
  0xed   :  { %293 = vst [vmem:[%s519_s2 + $0x20] sm:$0xff] %v226_v26  ;;  %301 = vst [vmem:[%s519_s2 + $0x60] sm:$0xff] %v258_v27 }
  0xee   :  { %v364_v28 = vpop.f32.mrf.mxu0  ;;  %v372_v29 = vpop.f32.mrf.mxu1 }
  0xef   :  { %296 = vst [vmem:[%s519_s2 + $0x38] sm:$0xff] %v364_v28  ;;  %304 = vst [vmem:[%s519_s2 + $0x78] sm:$0xff] %v372_v29 }
  0xf0   :  { %v229_v30 = vpop.f32.mrf.mxu0  ;;  %v261_v31 = vpop.f32.mrf.mxu1 }
  0xf1   :  { %294 = vst [vmem:[%s519_s2 + $0x28] sm:$0xff] %v229_v30  ;;  %302 = vst [vmem:[%s519_s2 + $0x68] sm:$0xff] %v261_v31 }

// kernel: gcn_forward.3
= control target key start
LH: loop header
LB: loop body
LE: loop exit
PB: predicated region body
PF: predicated region fallthrough
CT: control target
= control target key end

     0   :  { %vm84_vm0 = vcmask 261120   ;;  %s508_s1 = inlined_call_operand.vmem [shape: bf16[32,128], index: 1, kind: input, shape index: {}]   ;;  %s509_s0 = inlined_call_operand.vmem [shape: bf16[128,32], index: 0, kind: input, shape index: {}]   ;;  %s510_s2 = inlined_call_operand.vmem [shape: bf16[128,128], index: 2, kind: output, shape index: {}]  }
   0x1   :  { %v421_v0 = vld [vmem:[%s508_s1 + $0x8] sm:$0xff]   ;;  %v422_v1 = vld [vmem:[%s508_s1] sm:$0xff]   ;;  %v427_v6 = vld [vmem:[%s509_s0 + $0x10] sm:$0xff]  }
   0x2   :  { %397 = vmatprep.subr.bf16.mxu0 %v421_v0  ;;  %417 = vmatprep.subr.bf16.mxu1 %v421_v0  ;;  %v423_v2 = vld [vmem:[%s509_s0] sm:$0xff]   ;;  %v425_v4 = vld [vmem:[%s509_s0 + $0x8] sm:$0xff]   ;;  %v428_v7 = vld [vmem:[%s509_s0 + $0x30] sm:$0xff]  }
   0x3   :  { %398 = vmatpush3.bf16.msra.mxu0 %v421_v0  ;;  %419 = vmatpush3.bf16.msra.mxu1 %v421_v0  ;;  %v424_v3 = vld [vmem:[%s509_s0 + $0x20] sm:$0xff]   ;;  %v426_v5 = vld [vmem:[%s509_s0 + $0x28] sm:$0xff]   ;;  %v429_v8 = vld [vmem:[%s509_s0 + $0x18] sm:$0xff]  }
   0x4   :  { %399 = vmatprep.subr.bf16.mxu0 %v422_v1  ;;  %418 = vmatprep.subr.bf16.mxu1 %v422_v1  ;;  %v430_v9 = vld [vmem:[%s509_s0 + $0x38] sm:$0xff]  }
   0x5   :  { %401 = vmatprep.mubr.msk.bf16.mxu0 %vm84_vm0, %v423_v2  ;;  %409 = vmatprep.mubr.msk.bf16.mxu1 %vm84_vm0, %v424_v3 }
   0x7   :  { %400 = vmatpush3.bf16.msra.mxu0 %v422_v1  ;;  %420 = vmatpush3.bf16.msra.mxu1 %v422_v1 }
   0xa   :  { %402 = vmatmul.mubr.msk.bf16.vlgmr.msra.gmra.mxu0 %vm84_vm0, %v425_v4  ;;  %410 = vmatmul.mubr.msk.bf16.vlgmr.msra.gmra.mxu1 %vm84_vm0, %v426_v5 }
   0xb   :  { %405 = vmatprep.mubr.msk.bf16.mxu0 %vm84_vm0, %v427_v6  ;;  %413 = vmatprep.mubr.msk.bf16.mxu1 %vm84_vm0, %v428_v7 }
  0x12   :  { %406 = vmatmul.mubr.msk.bf16.gmra.mxu0 %vm84_vm0, %v429_v8  ;;  %414 = vmatmul.mubr.msk.bf16.gmra.mxu1 %vm84_vm0, %v430_v9 }
  0xca   :  { %v403_v10 = vpop.f32.mrf.mxu0  ;;  %v411_v11 = vpop.f32.mrf.mxu1 }
  0xcc   :  { %v143_v12 = vpop.f32.mrf.mxu0  ;;  %v175_v13 = vpop.f32.mrf.mxu1 }
  0xce   :  { %v404_v14 = vpop.f32.mrf.mxu0  ;;  %v412_v15 = vpop.f32.mrf.mxu1 }
  0xcf   :  { %v348_v16 = vpack.c.bf16 %v404_v14, %v403_v10  ;;  %v368_v17 = vpack.c.bf16 %v412_v15, %v411_v11 }
  0xd0   :  { %v146_v18 = vpop.f32.mrf.mxu0  ;;  %v178_v19 = vpop.f32.mrf.mxu1 }
  0xd1   :  { %380 = vst [vmem:[%s510_s2 + $0x8] sm:$0xff] %v348_v16   ;;  %384 = vst [vmem:[%s510_s2 + $0x28] sm:$0xff] %v368_v17   ;;  %v343_v20 = vpack.c.bf16 %v146_v18, %v143_v12  ;;  %v363_v21 = vpack.c.bf16 %v178_v19, %v175_v13 }
  0xd2   :  { %v407_v22 = vpop.f32.mrf.mxu0  ;;  %v415_v23 = vpop.f32.mrf.mxu1 }
  0xd3   :  { %344 = vst [vmem:[%s510_s2] sm:$0xff] %v343_v20   ;;  %383 = vst [vmem:[%s510_s2 + $0x20] sm:$0xff] %v363_v21  }
  0xd4   :  { %v159_v24 = vpop.f32.mrf.mxu0  ;;  %v191_v25 = vpop.f32.mrf.mxu1 }
  0xd6   :  { %v408_v26 = vpop.f32.mrf.mxu0  ;;  %v416_v27 = vpop.f32.mrf.mxu1 }
  0xd7   :  { %v358_v28 = vpack.c.bf16 %v408_v26, %v407_v22  ;;  %v378_v29 = vpack.c.bf16 %v416_v27, %v415_v23 }
  0xd8   :  { %v162_v30 = vpop.f32.mrf.mxu0  ;;  %v194_v31 = vpop.f32.mrf.mxu1 }
  0xd9   :  { %382 = vst [vmem:[%s510_s2 + $0x18] sm:$0xff] %v358_v28   ;;  %386 = vst [vmem:[%s510_s2 + $0x38] sm:$0xff] %v378_v29   ;;  %v353_v32 = vpack.c.bf16 %v162_v30, %v159_v24  ;;  %v373_v33 = vpack.c.bf16 %v194_v31, %v191_v25 }
  0xdb   :  { %381 = vst [vmem:[%s510_s2 + $0x10] sm:$0xff] %v353_v32   ;;  %385 = vst [vmem:[%s510_s2 + $0x30] sm:$0xff] %v373_v33  }

// kernel: gcn_forward.4
= control target key start
LH: loop header
LB: loop body
LE: loop exit
PB: predicated region body
PF: predicated region fallthrough
CT: control target
= control target key end

     0   :  { %s935_s1 = inlined_call_operand.vmem [shape: bf16[128,128], index: 1, kind: input, shape index: {}]   ;;  %s936_s0 = inlined_call_operand.vmem [shape: bf16[128,128], index: 0, kind: input, shape index: {}]   ;;  %s937_s2 = inlined_call_operand.vmem [shape: bf16[128,128], index: 2, kind: input, shape index: {}]   ;;  %s938_s3 = inlined_call_operand.vmem [shape: bf16[128,128], index: 3, kind: output, shape index: {}]  }
   0x1   :  { %v795_v0 = vld [vmem:[%s935_s1 + $0x38] sm:$0xff]   ;;  %v796_v1 = vld [vmem:[%s935_s1 + $0x30] sm:$0xff]   ;;  %v797_v2 = vld [vmem:[%s935_s1 + $0x28] sm:$0xff]  }
   0x2   :  { %731 = vmatprep.subr.bf16.mxu0 %v795_v0  ;;  %v798_v3 = vld [vmem:[%s935_s1 + $0x20] sm:$0xff]   ;;  %v799_v5 = vld [vmem:[%s935_s1 + $0x18] sm:$0xff]   ;;  %v800_v6 = vld [vmem:[%s935_s1 + $0x10] sm:$0xff]  }
   0x3   :  { %732 = vmatpush3.bf16.msra.mxu0 %v795_v0  ;;  %v803_v4 = vld [vmem:[%s936_s0] sm:$0xff]   ;;  %v811_v7 = vld [vmem:[%s937_s2 + $0x38] sm:$0xff]   ;;  %v812_v8 = vld [vmem:[%s937_s2 + $0x30] sm:$0xff]  }
   0x4   :  { %733 = vmatprep.subr.bf16.mxu0 %v796_v1  ;;  %747 = vmatprep.mubr.bf16.mxu0 %v803_v4  ;;  %v801_v9 = vld [vmem:[%s935_s1 + $0x8] sm:$0xff]   ;;  %v802_v11 = vld [vmem:[%s935_s1] sm:$0xff]   ;;  %v815_v13 = vld [vmem:[%s937_s2 + $0x18] sm:$0xff]  }
   0x5   :  { %763 = vmatprep.subr.bf16.mxu1 %v811_v7  ;;  %v813_v10 = vld [vmem:[%s937_s2 + $0x28] sm:$0xff]   ;;  %v814_v12 = vld [vmem:[%s937_s2 + $0x20] sm:$0xff]   ;;  %v805_v15 = vld [vmem:[%s936_s0 + $0x10] sm:$0xff]  }
   0x6   :  { %764 = vmatpush3.bf16.msra.mxu1 %v811_v7  ;;  %v804_v14 = vld [vmem:[%s936_s0 + $0x8] sm:$0xff]   ;;  %v806_v16 = vld [vmem:[%s936_s0 + $0x18] sm:$0xff]   ;;  %v807_v17 = vld [vmem:[%s936_s0 + $0x20] sm:$0xff]  }
   0x7   :  { %734 = vmatpush3.bf16.msra.mxu0 %v796_v1  ;;  %765 = vmatprep.subr.bf16.mxu1 %v812_v8  ;;  %v808_v18 = vld [vmem:[%s936_s0 + $0x28] sm:$0xff]   ;;  %v809_v19 = vld [vmem:[%s936_s0 + $0x30] sm:$0xff]   ;;  %v810_v20 = vld [vmem:[%s936_s0 + $0x38] sm:$0xff]  }
   0x8   :  { %735 = vmatprep.subr.bf16.mxu0 %v797_v2  ;;  %v816_v21 = vld [vmem:[%s937_s2 + $0x10] sm:$0xff]   ;;  %v817_v22 = vld [vmem:[%s937_s2 + $0x8] sm:$0xff]   ;;  %v818_v23 = vld [vmem:[%s937_s2] sm:$0xff]  }
   0xa   :  { %766 = vmatpush3.bf16.msra.mxu1 %v812_v8 }
   0xb   :  { %736 = vmatpush3.bf16.msra.mxu0 %v797_v2  ;;  %767 = vmatprep.subr.bf16.mxu1 %v813_v10 }
   0xc   :  { %737 = vmatprep.subr.bf16.mxu0 %v798_v3 }
   0xe   :  { %768 = vmatpush3.bf16.msra.mxu1 %v813_v10 }
   0xf   :  { %738 = vmatpush3.bf16.msra.mxu0 %v798_v3  ;;  %769 = vmatprep.subr.bf16.mxu1 %v814_v12 }
  0x10   :  { %739 = vmatprep.subr.bf16.mxu0 %v799_v5 }
  0x12   :  { %770 = vmatpush3.bf16.msra.mxu1 %v814_v12 }
  0x13   :  { %740 = vmatpush3.bf16.msra.mxu0 %v799_v5  ;;  %771 = vmatprep.subr.bf16.mxu1 %v815_v13 }
  0x14   :  { %741 = vmatprep.subr.bf16.mxu0 %v800_v6 }
  0x16   :  { %772 = vmatpush3.bf16.msra.mxu1 %v815_v13 }
  0x17   :  { %742 = vmatpush3.bf16.msra.mxu0 %v800_v6  ;;  %773 = vmatprep.subr.bf16.mxu1 %v816_v21 }
  0x18   :  { %743 = vmatprep.subr.bf16.mxu0 %v801_v9 }
  0x1a   :  { %774 = vmatpush3.bf16.msra.mxu1 %v816_v21 }
  0x1b   :  { %744 = vmatpush3.bf16.msra.mxu0 %v801_v9  ;;  %775 = vmatprep.subr.bf16.mxu1 %v817_v22 }
  0x1c   :  { %745 = vmatprep.subr.bf16.mxu0 %v802_v11 }
  0x1e   :  { %776 = vmatpush3.bf16.msra.mxu1 %v817_v22 }
  0x1f   :  { %746 = vmatpush3.bf16.msra.mxu0 %v802_v11  ;;  %777 = vmatprep.subr.bf16.mxu1 %v818_v23 }
  0x22   :  { %748 = vmatmul.mubr.bf16.vlgmr.msra.gmra.mxu0 %v804_v14  ;;  %778 = vmatpush3.bf16.msra.mxu1 %v818_v23 }
  0x23   :  { %751 = vmatprep.mubr.bf16.mxu0 %v805_v15 }
  0x2a   :  { %752 = vmatmul.mubr.bf16.gmra.mxu0 %v806_v16 }
  0x2b   :  { %755 = vmatprep.mubr.bf16.mxu0 %v807_v17 }
  0x32   :  { %756 = vmatmul.mubr.bf16.gmra.mxu0 %v808_v18 }
  0x33   :  { %759 = vmatprep.mubr.bf16.mxu0 %v809_v19 }
  0x3a   :  { %760 = vmatmul.mubr.bf16.gmra.mxu0 %v810_v20 }
  0xe2   :  { %v749_v24 = vpop.f32.mrf.mxu0 }
  0xe3   :  { %v329_v31 = vmax.f32 %v749_v24, 0.0 }
  0xe4   :  { %v213_v25 = vpop.f32.mrf.mxu0 }
  0xe5   :  { %v327_v29 = vmax.f32 %v213_v25, 0.0 }
  0xe6   :  { %v750_v26 = vpop.f32.mrf.mxu0 }
  0xe7   :  { %v330_v27 = vmax.f32 %v750_v26, 0.0 }
  0xe8   :  { %v216_v28 = vpop.f32.mrf.mxu0 }
  0xe9   :  { %v328_v30 = vmax.f32 %v216_v28, 0.0  ;;  %v344_v34 = vpack.c.bf16 %v330_v27, %v329_v31 }
  0xea   :  { %v753_v32 = vpop.f32.mrf.mxu0 }
  0xeb   :  { %v343_v33 = vpack.c.bf16 %v328_v30, %v327_v29  ;;  %v333_v41 = vmax.f32 %v753_v32, 0.0 }
  0xec   :  { %v229_v35 = vpop.f32.mrf.mxu0 }
  0xed   :  { %779 = vmatprep.mubr.bf16.mxu1 %v343_v33  ;;  %v331_v39 = vmax.f32 %v229_v35, 0.0 }
  0xee   :  { %v754_v36 = vpop.f32.mrf.mxu0  ;;  %780 = vmatmul.mubr.bf16.vlgmr.msra.gmra.mxu1 %v344_v34 }
  0xef   :  { %v334_v37 = vmax.f32 %v754_v36, 0.0 }
  0xf0   :  { %v232_v38 = vpop.f32.mrf.mxu0 }
  0xf1   :  { %v332_v40 = vmax.f32 %v232_v38, 0.0  ;;  %v346_v44 = vpack.c.bf16 %v334_v37, %v333_v41 }
  0xf2   :  { %v757_v42 = vpop.f32.mrf.mxu0 }
  0xf3   :  { %v345_v43 = vpack.c.bf16 %v332_v40, %v331_v39  ;;  %v337_v51 = vmax.f32 %v757_v42, 0.0 }
  0xf4   :  { %v245_v45 = vpop.f32.mrf.mxu0 }
  0xf5   :  { %783 = vmatprep.mubr.bf16.mxu1 %v345_v43  ;;  %v335_v49 = vmax.f32 %v245_v45, 0.0 }
  0xf6   :  { %v758_v46 = vpop.f32.mrf.mxu0  ;;  %784 = vmatmul.mubr.bf16.gmra.mxu1 %v346_v44 }
  0xf7   :  { %v338_v47 = vmax.f32 %v758_v46, 0.0 }
  0xf8   :  { %v248_v48 = vpop.f32.mrf.mxu0 }
  0xf9   :  { %v336_v50 = vmax.f32 %v248_v48, 0.0  ;;  %v348_v54 = vpack.c.bf16 %v338_v47, %v337_v51 }
  0xfa   :  { %v761_v52 = vpop.f32.mrf.mxu0 }
  0xfb   :  { %v347_v53 = vpack.c.bf16 %v336_v50, %v335_v49  ;;  %v341_v61 = vmax.f32 %v761_v52, 0.0 }
  0xfc   :  { %v261_v55 = vpop.f32.mrf.mxu0 }
  0xfd   :  { %787 = vmatprep.mubr.bf16.mxu1 %v347_v53  ;;  %v339_v59 = vmax.f32 %v261_v55, 0.0 }
  0xfe   :  { %v762_v56 = vpop.f32.mrf.mxu0  ;;  %788 = vmatmul.mubr.bf16.gmra.mxu1 %v348_v54 }
  0xff   :  { %v342_v57 = vmax.f32 %v762_v56, 0.0 }
 0x100   :  { %v264_v58 = vpop.f32.mrf.mxu0 }
 0x101   :  { %v340_v60 = vmax.f32 %v264_v58, 0.0  ;;  %v350_v63 = vpack.c.bf16 %v342_v57, %v341_v61 }
 0x103   :  { %v349_v62 = vpack.c.bf16 %v340_v60, %v339_v59 }
 0x105   :  { %791 = vmatprep.mubr.bf16.mxu1 %v349_v62 }
 0x106   :  { %792 = vmatmul.mubr.bf16.gmra.mxu1 %v350_v63 }
 0x1ae   :  { %v781_v0 = vpop.f32.mrf.mxu1 }
 0x1b0   :  { %v449_v1 = vpop.f32.mrf.mxu1 }
 0x1b2   :  { %v782_v2 = vpop.f32.mrf.mxu1 }
 0x1b3   :  { %v660_v3 = vpack.c.bf16 %v782_v2, %v781_v0 }
 0x1b4   :  { %v452_v4 = vpop.f32.mrf.mxu1 }
 0x1b5   :  { %692 = vst [vmem:[%s938_s3 + $0x8] sm:$0xff] %v660_v3   ;;  %v655_v5 = vpack.c.bf16 %v452_v4, %v449_v1 }
 0x1b6   :  { %v785_v6 = vpop.f32.mrf.mxu1 }
 0x1b7   :  { %656 = vst [vmem:[%s938_s3] sm:$0xff] %v655_v5  }
 0x1b8   :  { %v465_v7 = vpop.f32.mrf.mxu1 }
 0x1ba   :  { %v786_v8 = vpop.f32.mrf.mxu1 }
 0x1bb   :  { %v670_v9 = vpack.c.bf16 %v786_v8, %v785_v6 }
 0x1bc   :  { %v468_v10 = vpop.f32.mrf.mxu1 }
 0x1bd   :  { %694 = vst [vmem:[%s938_s3 + $0x18] sm:$0xff] %v670_v9   ;;  %v665_v11 = vpack.c.bf16 %v468_v10, %v465_v7 }
 0x1be   :  { %v789_v12 = vpop.f32.mrf.mxu1 }
 0x1bf   :  { %693 = vst [vmem:[%s938_s3 + $0x10] sm:$0xff] %v665_v11  }
 0x1c0   :  { %v481_v13 = vpop.f32.mrf.mxu1 }
 0x1c2   :  { %v790_v14 = vpop.f32.mrf.mxu1 }
 0x1c3   :  { %v680_v15 = vpack.c.bf16 %v790_v14, %v789_v12 }
 0x1c4   :  { %v484_v16 = vpop.f32.mrf.mxu1 }
 0x1c5   :  { %696 = vst [vmem:[%s938_s3 + $0x28] sm:$0xff] %v680_v15   ;;  %v675_v17 = vpack.c.bf16 %v484_v16, %v481_v13 }
 0x1c6   :  { %v793_v18 = vpop.f32.mrf.mxu1 }
 0x1c7   :  { %695 = vst [vmem:[%s938_s3 + $0x20] sm:$0xff] %v675_v17  }
 0x1c8   :  { %v497_v19 = vpop.f32.mrf.mxu1 }
 0x1ca   :  { %v794_v20 = vpop.f32.mrf.mxu1 }
 0x1cb   :  { %v690_v21 = vpack.c.bf16 %v794_v20, %v793_v18 }
 0x1cc   :  { %v500_v22 = vpop.f32.mrf.mxu1 }
 0x1cd   :  { %698 = vst [vmem:[%s938_s3 + $0x38] sm:$0xff] %v690_v21   ;;  %v685_v23 = vpack.c.bf16 %v500_v22, %v497_v19 }
 0x1cf   :  { %697 = vst [vmem:[%s938_s3 + $0x30] sm:$0xff] %v685_v23  }

</bundles_post_ra>
